<compile_context>
chip_gen: v7x
topology: tpu7x:2x2x1
jax: 0.10.0
libtpu: 0.0.40
codegen_flags: <defaults>
</compile_context>

<pallas_src>
import functools

import jax
import jax.numpy as jnp
from jax.experimental import pallas as pl
from jax.experimental.pallas import tpu as pltpu


def _round_up(a, b):
    return ((a + b - 1) // b) * b


def _fc_kernel(x_ref, w_ref, shift_ref, o_ref, *, leaky_slope):
    # MXU matmul (f32 accumulate) + tiny fused epilogue on the VPU.
    z = jnp.dot(x_ref[...], w_ref[...], preferred_element_type=jnp.float32)
    z = z + shift_ref[...]                      # (tm, tn) + (1, tn) broadcast: folded bias+BN
    o_ref[...] = jnp.where(z >= 0, z, leaky_slope * z).astype(o_ref.dtype)


def fully_connected_forward(x, w_kn, bias, gamma, beta, running_mean, running_var,
                            *, eps=1e-5, leaky_slope=0.2, tm=256, tn=256,
                            matmul_dtype=None):
    """x: [M, K] f32, w_kn: [K, N] f32 (PyTorch weight pre-transposed), per-feature params: [N].

    Returns [M, N] in x.dtype. matmul_dtype=jnp.bfloat16 halves weight traffic / doubles MXU
    throughput on v6e/v7x (accumulation stays f32)."""
    M, K = x.shape
    N = w_kn.shape[1]
    out_dtype = x.dtype

    # --- one-time parameter folding (weights are constants across calls) ---------------------
    scale = gamma * jax.lax.rsqrt(running_var + eps)          # gamma / sqrt(var + eps)
    shift = beta - running_mean * scale
    w_folded = w_kn * scale[None, :]                          # W' = W * scale  (per out column)
    shift_folded = bias * scale + shift                       # b' = b*scale + shift

    # --- padding to lane-dense / sublane-aligned tiles ---------------------------------------
    M_pad = _round_up(M, 8)
    tm = max(8, min(_round_up(tm, 8), M_pad))
    M_pad = _round_up(M_pad, tm)

    N_pad = _round_up(N, 128)
    tn = max(128, min(_round_up(tn, 128), N_pad))
    N_pad = _round_up(N_pad, tn)

    x_p = x
    if M_pad != M:
        x_p = jnp.pad(x, ((0, M_pad - M), (0, 0)))
    w_p = w_folded
    shift_p = shift_folded
    if N_pad != N:
        w_p = jnp.pad(w_folded, ((0, 0), (0, N_pad - N)))
        shift_p = jnp.pad(shift_folded, (0, N_pad - N))
    shift_p = shift_p.reshape(1, N_pad).astype(jnp.float32)

    if matmul_dtype is not None:
        x_p = x_p.astype(matmul_dtype)
        w_p = w_p.astype(matmul_dtype)

    grid = (M_pad // tm, N_pad // tn)

    out = pl.pallas_call(
        functools.partial(_fc_kernel, leaky_slope=leaky_slope),
        out_shape=jax.ShapeDtypeStruct((M_pad, N_pad), out_dtype),
        grid=grid,
        in_specs=[
            pl.BlockSpec((tm, K), lambda i, j: (i, 0)),    # x row tile (K resident)
            pl.BlockSpec((K, tn), lambda i, j: (0, j)),    # folded-weight column tile
            pl.BlockSpec((1, tn), lambda i, j: (0, j)),    # folded bias+BN shift
        ],
        out_specs=pl.BlockSpec((tm, tn), lambda i, j: (i, j)),
        compiler_params=pltpu.CompilerParams(
            dimension_semantics=("parallel", "parallel"),
            vmem_limit_bytes=48 * 1024 * 1024,
        ),
    )(x_p, w_p, shift_p)

    if M_pad != M or N_pad != N:
        out = out[:M, :N]
    return out


def _reference(x, w_kn, bias, gamma, beta, running_mean, running_var,
               eps=1e-5, leaky_slope=0.2):
    z = x @ w_kn + bias
    z = gamma * (z - running_mean) / jnp.sqrt(running_var + eps) + beta
    return jnp.where(z >= 0, z, leaky_slope * z)


if __name__ == "__main__":
    # Module config: input_dim=32, output_dim=64, batch=8, LeakyReLU(0.2), dropout=0.2, BN.
    B, K, N = 8, 32, 64
    key = jax.random.PRNGKey(0)
    kx, kw, kb, kg, kbe, km, kv = jax.random.split(key, 7)

    x = jax.random.normal(kx, (B, K), dtype=jnp.float32)
    # PyTorch Linear stores weight as [N, K]; pre-transpose to [K, N] for the kernel.
    w_nk = jax.random.normal(kw, (N, K), dtype=jnp.float32) * (1.0 / jnp.sqrt(K))
    w_kn = w_nk.T
    bias = jax.random.normal(kb, (N,), dtype=jnp.float32) * 0.1
    gamma = 1.0 + 0.1 * jax.random.normal(kg, (N,), dtype=jnp.float32)
    beta = 0.1 * jax.random.normal(kbe, (N,), dtype=jnp.float32)
    running_mean = 0.1 * jax.random.normal(km, (N,), dtype=jnp.float32)
    running_var = jax.random.uniform(kv, (N,), dtype=jnp.float32, minval=0.5, maxval=1.5)

    out = fully_connected_forward(x, w_kn, bias, gamma, beta, running_mean, running_var)
    out = jax.block_until_ready(out)

    ref = _reference(x, w_kn, bias, gamma, beta, running_mean, running_var)
    assert out.shape == (B, N)
    assert jnp.allclose(out, ref, atol=1e-5, rtol=1e-5), "mismatch vs JAX reference"

    print("KERNEL_OK")
</pallas_src>

<mosaic_0001>
module attributes {stable_mosaic.version = 11 : i64} {
  func.func @_fc_kernel(%arg0: i32, %arg1: i32, %arg2: memref<8x32xf32, #tpu.memory_space<vmem>>, %arg3: memref<32x128xf32, #tpu.memory_space<vmem>>, %arg4: memref<1x128xf32, #tpu.memory_space<vmem>>, %arg5: memref<8x128xf32, #tpu.memory_space<vmem>>) attributes {dimension_semantics = [#tpu.dimension_semantics<parallel>, #tpu.dimension_semantics<parallel>], iteration_bounds = array<i64: 1, 1>, scalar_prefetch = 0 : i64, scratch_operands = 0 : i64, tpu.core_type = #tpu.core_type<tc>, window_params = [{transform_indices = @transform_0, window_bounds = array<i64: 8, 32>}, {transform_indices = @transform_1, window_bounds = array<i64: 32, 128>}, {transform_indices = @transform_2, window_bounds = array<i64: 1, 128>}, {transform_indices = @transform_3, window_bounds = array<i64: 8, 128>}]} {
    %c0 = arith.constant 0 : index
    %c0_0 = arith.constant 0 : index
    %0 = vector.load %arg2[%c0, %c0_0] : memref<8x32xf32, #tpu.memory_space<vmem>>, vector<8x32xf32>
    %c0_1 = arith.constant 0 : index
    %c0_2 = arith.constant 0 : index
    %1 = vector.load %arg3[%c0_1, %c0_2] : memref<32x128xf32, #tpu.memory_space<vmem>>, vector<32x128xf32>
    %cst = arith.constant dense<0.000000e+00> : vector<8x128xf32>
    %2 = tpu.matmul %0, %1, %cst {dimension_numbers = #tpu.dot_dimension_numbers<[1], [0], [0], [1], [0, 0, 1, 1], [], []>} : vector<8x32xf32>, vector<32x128xf32>, vector<8x128xf32> -> vector<8x128xf32>
    %c0_3 = arith.constant 0 : index
    %c0_4 = arith.constant 0 : index
    %3 = vector.load %arg4[%c0_3, %c0_4] : memref<1x128xf32, #tpu.memory_space<vmem>>, vector<1x128xf32>
    %4 = vector.broadcast %3 : vector<1x128xf32> to vector<8x128xf32>
    %5 = arith.addf %2, %4 : vector<8x128xf32>
    %cst_5 = arith.constant 0.000000e+00 : f32
    %6 = vector.broadcast %cst_5 : f32 to vector<8x128xf32>
    %7 = arith.cmpf oge, %5, %6 : vector<8x128xf32>
    %cst_6 = arith.constant 2.000000e-01 : f32
    %8 = vector.broadcast %cst_6 : f32 to vector<8x128xf32>
    %9 = arith.mulf %8, %5 : vector<8x128xf32>
    %10 = arith.select %7, %5, %9 : vector<8x128xi1>, vector<8x128xf32>
    %c0_7 = arith.constant 0 : index
    %c0_8 = arith.constant 0 : index
    %11 = vector.load %arg5[%c0_7, %c0_8] : memref<8x128xf32, #tpu.memory_space<vmem>>, vector<8x128xf32>
    tpu.vector_store %arg5[%c0_7, %c0_8], %10 {strides = array<i32>} : memref<8x128xf32, #tpu.memory_space<vmem>>, vector<8x128xf32>,
    return
  }
  func.func @transform_0(%arg0: i32, %arg1: i32) -> (i32, i32) {
    %c0_i32 = arith.constant 0 : i32
    %c0_i32_0 = arith.constant 0 : i32
    return %arg0, %c0_i32 : i32, i32
  }
  func.func @transform_1(%arg0: i32, %arg1: i32) -> (i32, i32) {
    %c0_i32 = arith.constant 0 : i32
    %c0_i32_0 = arith.constant 0 : i32
    return %c0_i32, %arg1 : i32, i32
  }
  func.func @transform_2(%arg0: i32, %arg1: i32) -> (i32, i32) {
    %c0_i32 = arith.constant 0 : i32
    %c0_i32_0 = arith.constant 0 : i32
    return %c0_i32, %arg1 : i32, i32
  }
  func.func @transform_3(%arg0: i32, %arg1: i32) -> (i32, i32) {
    %c0_i32 = arith.constant 0 : i32
    return %arg0, %arg1 : i32, i32
  }
}

</mosaic_0001>

<bundles_post_ra>
// kernel: tpu_custom_call.1
= control target key start
LH: loop header
LB: loop body
LE: loop exit
PB: predicated region body
PF: predicated region fallthrough
CT: control target
= control target key end

     0   :  { %8 = vsyncpa [#allocation3], 0  ;;  %s325_s0 = inlined_call_operand.hbm [shape: f32[8,32], index: 0, kind: input, shape index: {}]   ;;  %s326_s1 = inlined_call_operand.hbm [shape: f32[32,128], index: 1, kind: input, shape index: {}]   ;;  %s327_s2 = inlined_call_operand.vmem [shape: f32[1,128], index: 2, kind: input, shape index: {}]   ;;  %s328_s3 = inlined_call_operand.hbm [shape: f32[8,128], index: 3, kind: output, shape index: {}]  }
   0x1   :  { %9 = vsyncpa [#allocation6], 0 }
   0x2   :  { %10 = vsyncpa [#allocation4], 0  ;;  %s251_s12 = smov [#allocation2]   ;;  %s252_s14 = smov [#allocation5]  }
   0x3   :  { %s17_s13 = sshll.u32 %s251_s12, 4  ;;  %s26_s15 = sshll.u32 %s252_s14, 4  ;;  %s18_s13 = int_to_ptr.vmem [resolvable:$true] %s17_s13  ;;  %s279_s15 = int_to_ptr.vmem [resolvable:$true] %s26_s15 }
   0x4   :  { %s179_s18 = scalar_lea.hbm %s325_s0, 128 }
   0x5   :  { %p180_p0 = scmp.ne.s32.totalorder %s325_s0, %s179_s18  ;;  %p183_p1 = scmp.lt.u32.totalorder %s179_s18, %s325_s0 }
   0x7   :  { %p185_p2 = pnand %p183_p1, %p180_p0 }
   0x9   :  { %188 = shalt.err (!%p185_p2)
}
   0xa   :  { %s189_s23 = scalar_lea.vmem %s18_s13, 128  ;;  %p194_p4 = scmp.lt.s32.totalorder %s18_s13, %s18_s13 }
   0xb   :  { %p190_p3 = scmp.ne.s32.totalorder %s18_s13, %s189_s23  ;;  %p195_p5 = scmp.lt.s32.totalorder %s189_s23, %s189_s23 }
   0xd   :  { %p196_p6 = por %p195_p5, %p194_p4 }
   0xf   :  { %p197_p7 = pnand %p196_p6, %p190_p3 }
  0x11   :  { %200 = shalt.err (!%p197_p7)
}
  0x12   :  { %20 = dma.hbm_to_vmem [thread:$0]  %s325_s0, 128, %s18_s13, [#allocation3]  }
  0x13   :  { %s201_s28 = scalar_lea.hbm %s326_s1, 512 }
  0x14   :  { %p202_p8 = scmp.ne.s32.totalorder %s326_s1, %s201_s28  ;;  %p205_p9 = scmp.lt.u32.totalorder %s201_s28, %s326_s1 }
  0x16   :  { %p207_p10 = pnand %p205_p9, %p202_p8 }
  0x18   :  { %210 = shalt.err (!%p207_p10)
}
  0x19   :  { %s211_s6 = scalar_lea.vmem %s279_s15, 512  ;;  %p216_p12 = scmp.lt.s32.totalorder %s279_s15, %s279_s15 }
  0x1a   :  { %p212_p11 = scmp.ne.s32.totalorder %s279_s15, %s211_s6  ;;  %p217_p13 = scmp.lt.s32.totalorder %s211_s6, %s211_s6 }
  0x1c   :  { %p218_p0 = por %p217_p13, %p216_p12 }
  0x1e   :  { %p219_p1 = pnand %p218_p0, %p212_p11 }
  0x20   :  { %222 = shalt.err (!%p219_p1)
}
  0x21   :  { %s253_s0 = smov 128   ;;  %s254_s7 = smov 8  }
  0x22   :  { %32 = dma.hbm_to_vmem [thread:$0]  %s326_s1, 512, %s279_s15, [#allocation6], %s253_s0, %s253_s0, %s254_s7  }
  0x23   :  { %245 = dma.done.wait [#allocation3], 128  }
  0x24   :  { %246 = vsyncadd [#allocation3], 4294967168 }
  0x25   :  { %247 = dma.done.wait [#allocation6], 512  }
  0x26   :  { %248 = vsyncadd [#allocation6], 4294966784  ;;  %v255_v0 = vmov 0.0|0.0   ;;  %vm256_vm0 = vmmov 0   ;;  %v257_v1 = vmov 0.0   ;;  %v42_v2 = vld [vmem:[#allocation5] sm:$0xff] }
  0x27   :  { %165 = vmatprep.subr.bf16.mxu0 %v255_v0  ;;  %162 = vmatprep.mubr.msk.f32.mxu0 %vm256_vm0, %v257_v1  ;;  %v43_v3 = vld [vmem:[#allocation5 + $0x8] sm:$0xff]  ;;  %v44_v4 = vld [vmem:[#allocation5 + $0x10] sm:$0xff]  ;;  %v45_v6 = vld [vmem:[#allocation5 + $0x18] sm:$0xff]  ;;  %vm53_vm1 = vcmask 261120   ;;  %s258_s11 = smov [#allocation7]  }
  0x28   :  { %v166_v5 = vpack.c.bf16 %v43_v3, %v42_v2  ;;  %v169_v7 = vpack.c.bf16 %v45_v6, %v44_v4  ;;  %v41_v8 = vld [vmem:[#allocation2] sm:$0xff]  ;;  %s137_s12 = sshll.u32 %s258_s11, 4  ;;  %s138_s12 = int_to_ptr.vmem [resolvable:$true] %s137_s12 }
  0x29   :  { %v147_v9 = vld [vmem:[%s327_s2] ss:$0 sm:$0xff]  ;;  %s223_s13 = scalar_lea.vmem %s138_s12, 128  ;;  %p228_p3 = scmp.lt.s32.totalorder %s138_s12, %s138_s12 }
  0x2a   :  { %167 = vmatpush3.bf16.msra.mxu0 %v166_v5  ;;  %p224_p2 = scmp.ne.s32.totalorder %s138_s12, %s223_s13  ;;  %p229_p4 = scmp.lt.s32.totalorder %s223_s13, %s223_s13 }
  0x2b   :  { %168 = vmatprep.subr.bf16.mxu0 %v255_v0 }
  0x2c   :  { %p230_p5 = por %p229_p4, %p228_p3 }
  0x2e   :  { %170 = vmatpush3.bf16.msra.mxu0 %v169_v7  ;;  %p231_p6 = pnand %p230_p5, %p224_p2 }
  0x31   :  { %163 = vmatmul.mubr.msk.f32.vlgmr.msra.gmra.mrb[0].mxu0 %vm53_vm1, %v41_v8 }
 0x104   :  { %v123_v10 = vpop.f32.mrb[0].mxu0 }
 0x105   :  { %v124_v11 = vadd.f32 %v147_v9, %v123_v10  ;;  %v164_v12 = vpop.f32.mrb[1].mxu0 }
 0x107   :  { %v128_v13 = vmul.f32 0.2, %v124_v11  ;;  %vm127_vm2 = vcmp.ge.f32.partialorder %v124_v11, 0.0 }
 0x109   :  { %v129_v14 = vsel %vm127_vm2, %v124_v11, %v128_v13 }
 0x10a   :  { %130 = vst [vmem:[#allocation7] sm:$0xff] %v129_v14 }
 0x10b   :  { %234 = shalt.err (!%p231_p6)
}
 0x10c   :  { %s235_s2 = scalar_lea.hbm %s328_s3, 128 }
 0x10d   :  { %p236_p7 = scmp.ne.s32.totalorder %s328_s3, %s235_s2  ;;  %p239_p8 = scmp.lt.u32.totalorder %s235_s2, %s328_s3 }
 0x10f   :  { %p241_p9 = pnand %p239_p8, %p236_p7 }
 0x111   :  { %244 = shalt.err (!%p241_p9)
}
 0x112   :  { %140 = dma.vmem_to_hbm [thread:$0]  %s138_s12, 128, %s328_s3, [#allocation4]  }
 0x113   :  { %249 = dma.done.wait [#allocation4], 128  }
 0x114   :  { %250 = vsyncadd [#allocation4], 4294967168 }
 0x115   :  { %144 = vsyncpa [#allocation3], 1 }
 0x116   :  { %145 = vsyncpa [#allocation6], 1 }
 0x117   :  { %146 = vsyncpa [#allocation4], 1 }

</bundles_post_ra>
